<compile_context>
chip_gen: v7x
topology: tpu7x:2x2x1
jax: 0.10.0
libtpu: 0.0.40
codegen_flags: <defaults>
</compile_context>

<pallas_src>
import jax
import jax.numpy as jnp
from jax.experimental import pallas as pl
from jax.experimental.pallas import tpu as pltpu

_LANE = 128
_SUBLANE = 8


# ----------------------------- kernel bodies ------------------------------

def _noise_injection_kernel(x_ref, noise_ref, w_ref, o_ref):
    # x_ref / o_ref : (Cb, St); noise_ref : (1, St); w_ref : (Cb, 1)
    o_ref[...] = x_ref[...] + w_ref[...] * noise_ref[...]


def _styled_post_conv_kernel(x_ref, noise_ref, w_ref, b_ref, s_ref, o_ref):
    # x_ref / o_ref : (Cb, St); noise_ref : (1, St)
    # w_ref / b_ref : (Cb, 1) per-channel; s_ref : (Cb, 1) per-(batch,channel)
    y = (x_ref[...] + w_ref[...] * noise_ref[...] + b_ref[...]) * s_ref[...]
    o_ref[...] = jnp.where(y >= 0, y, 0.2 * y)          # LeakyReLU(0.2)


# ----------------------------- tiling helpers ------------------------------

def _tpu_generation_defaults():
    """(max_block_bytes, vmem_limit_cap) sized per TPU generation."""
    try:
        kind = jax.devices()[0].device_kind.lower()
    except Exception:  # pragma: no cover - defensive
        kind = ""
    if "v7" in kind:                 # 64 MiB VMEM / TC
        return 8 << 20, 44 << 20
    if "v5" in kind or "v6" in kind:  # 128 MiB VMEM
        return 16 << 20, 100 << 20
    return 8 << 20, 44 << 20          # unknown -> conservative


def _pick_tiles(C, S, dtype, max_block_bytes):
    """Choose (Cb, St): lane-dense spatial tile + multi-channel slab.

    St is a multiple of 128 (or the whole tiny plane); Cb is a multiple of the
    dtype's sublane quantum (or the whole channel dim).  Neither has to divide
    its array dim: the grid uses pl.cdiv and one masked tail block is cheaper
    than shrinking every block.
    """
    itemsize = jnp.dtype(dtype).itemsize
    sub = {4: _SUBLANE, 2: 2 * _SUBLANE, 1: 4 * _SUBLANE}.get(itemsize, _SUBLANE)
    max_elems = max(_LANE, max_block_bytes // itemsize)

    if S < _LANE:
        # TODO(synk): for 4x4 / 8x8 planes the lane dim is underfilled (masked
        # stores); folding channels into the lane dim (or bypassing Pallas)
        # would be better for those tiny early-StyleGAN layers.
        St = S
    else:
        St = (min(S, max_elems) // _LANE) * _LANE   # lane-dense; ragged tail OK

    per_row = max(1, max_elems // St)
    if per_row >= C:
        Cb = C
    else:
        Cb = min(C, max(sub, (per_row // sub) * sub))
    return Cb, St


def _launch(kernel, x, noise, ch_params, bc_params, *, max_block_bytes=None):
    """Run `kernel` over (N, C, H, W) with lane-dense (C-slab x S-tile) blocks.

    ch_params : per-channel params, broadcastable to (C,)   -> (Cb, 1) blocks
    bc_params : per-(batch, channel) params, shape (N, C)   -> (Cb, 1) blocks
    """
    N, C, H, W = x.shape
    S = H * W

    x3 = x.reshape(N, C, S)                         # lane-dense, free reshape
    n3 = noise.reshape(N, 1, S)
    ch = [p.reshape(C, 1).astype(x.dtype) for p in ch_params]
    bc = [p.reshape(N, C, 1).astype(x.dtype) for p in bc_params]

    default_mbb, vmem_cap = _tpu_generation_defaults()
    mbb = default_mbb if max_block_bytes is None else max_block_bytes
    Cb, St = _pick_tiles(C, S, x.dtype, mbb)

    # N and spatial tiles are independent ("parallel", megacore-shardable);
    # channel is innermost + "arbitrary" so the shared noise tile stays
    # VMEM-resident across the channel sweep (its index ignores ci).
    grid = (N, pl.cdiv(S, St), pl.cdiv(C, Cb))

    itemsize = jnp.dtype(x.dtype).itemsize
    nparams = len(ch) + len(bc)
    # Double-buffered pipeline footprint: x block + out block + noise block
    # (+ tiny param blocks), times 2, plus headroom for Mosaic scratch.
    need = 2 * (2 * Cb * St + St) * itemsize + 2 * nparams * Cb * itemsize
    vmem_limit = int(min(vmem_cap, max(32 << 20, need + (8 << 20))))

    in_specs = [
        # x: (Cb, St) slab per (n, spatial-tile, channel-block) step
        pl.BlockSpec((None, Cb, St), lambda n, si, ci: (n, ci, si)),
        # noise: shared across channels -> stays resident across the ci sweep
        pl.BlockSpec((None, 1, St), lambda n, si, ci: (n, 0, si)),
    ]
    in_specs += [pl.BlockSpec((Cb, 1), lambda n, si, ci: (ci, 0)) for _ in ch]
    in_specs += [pl.BlockSpec((None, Cb, 1), lambda n, si, ci: (n, ci, 0)) for _ in bc]

    out = pl.pallas_call(
        kernel,
        out_shape=jax.ShapeDtypeStruct((N, C, S), x.dtype),
        grid=grid,
        in_specs=in_specs,
        out_specs=pl.BlockSpec((None, Cb, St), lambda n, si, ci: (n, ci, si)),
        input_output_aliases={0: 0},   # out reuses x's buffer (identical specs)
        compiler_params=pltpu.CompilerParams(
            dimension_semantics=("parallel", "parallel", "arbitrary"),
            vmem_limit_bytes=vmem_limit,
        ),
    )(x3, n3, *ch, *bc)

    return out.reshape(N, C, H, W)


# ----------------------------- public wrappers ------------------------------

def noise_injection(x, weight, noise=None, *, key=None, max_block_bytes=None):
    """NoiseInjection.forward: x + weight * noise.

    x: (N, C, H, W); weight: (1, C, 1, 1); noise: (N, 1, H, W) or None.
    """
    N, C, H, W = x.shape
    if noise is None:
        assert key is not None, "need a PRNG key when noise is not provided"
        # TODO(synk): generate the noise tile in-kernel (pltpu.prng_seed +
        # pltpu.stateful_normal at ci==0, stashed in VMEM scratch) to save one
        # HBM pass; kept in the wrapper so the jax.random stream is exact.
        noise = jax.random.normal(key, (N, 1, H, W), dtype=x.dtype)
    return _launch(_noise_injection_kernel, x, noise, [weight], [],
                   max_block_bytes=max_block_bytes)


def styled_post_conv(x, noise_weight, bias, style, noise=None, *, key=None,
                     max_block_bytes=None):
    """Fused StyledConvBlock tail: LeakyReLU_0.2((x + w*noise + bias) * style).

    x: (N, C, H, W); noise_weight, bias: (1, C, 1, 1); style: (N, C);
    noise: (N, 1, H, W) or None.
    """
    N, C, H, W = x.shape
    if noise is None:
        assert key is not None, "need a PRNG key when noise is not provided"
        noise = jax.random.normal(key, (N, 1, H, W), dtype=x.dtype)
    return _launch(_styled_post_conv_kernel, x, noise, [noise_weight, bias],
                   [style], max_block_bytes=max_block_bytes)


# ----------------------------------- test -----------------------------------

if __name__ == "__main__":
    N, C, H, W = 2, 4, 16, 16

    key = jax.random.PRNGKey(0)
    kx, knoise, kstyle, k2x, k2n, k2s = jax.random.split(key, 6)

    x = jax.random.normal(kx, (N, C, H, W), dtype=jnp.float32)
    noise = jax.random.normal(knoise, (N, 1, H, W), dtype=jnp.float32)

    weight_zeros = jnp.zeros((1, C, 1, 1), dtype=jnp.float32)       # PyTorch init
    weight = (0.1 * jnp.arange(1, C + 1, dtype=jnp.float32)).reshape(1, C, 1, 1)
    bias = (0.02 * jnp.arange(1, C + 1, dtype=jnp.float32)).reshape(1, C, 1, 1)
    style = jax.random.normal(kstyle, (N, C), dtype=jnp.float32)

    # 1) bare NoiseInjection, zero weight (fresh PyTorch module) -> identity.
    out0 = jax.block_until_ready(noise_injection(x, weight_zeros, noise))
    assert jnp.allclose(out0, x, atol=1e-6), "mismatch (zero weight)"

    # 2) bare NoiseInjection, non-zero weight.
    out1 = jax.block_until_ready(noise_injection(x, weight, noise))
    assert jnp.allclose(out1, x + weight * noise, atol=1e-6), "mismatch (noise inject)"

    # 3) fused StyledConvBlock tail vs. reference.
    t = (x + weight * noise + bias) * style.reshape(N, C, 1, 1)
    ref_fused = jnp.where(t >= 0, t, 0.2 * t)
    out2 = jax.block_until_ready(styled_post_conv(x, weight, bias, style, noise))
    assert jnp.allclose(out2, ref_fused, atol=1e-5), "mismatch (fused tail)"

    # 4) noise=None path (noise generated in the wrapper, as in PyTorch).
    out3 = jax.block_until_ready(noise_injection(x, weight, noise=None, key=knoise))
    assert out3.shape == (N, C, H, W)

    # 5) ragged-tile path: C not a multiple of the channel block, S not a
    #    multiple of the spatial tile, tiny budget -> grid=(2, 2, 2) with one
    #    masked tail block on each tiled axis.
    N2, C2, H2, W2 = 2, 12, 20, 20
    x2 = jax.random.normal(k2x, (N2, C2, H2, W2), dtype=jnp.float32)
    n2 = jax.random.normal(k2n, (N2, 1, H2, W2), dtype=jnp.float32)
    w2 = (0.05 * jnp.arange(1, C2 + 1, dtype=jnp.float32)).reshape(1, C2, 1, 1)
    b2 = (0.01 * jnp.arange(1, C2 + 1, dtype=jnp.float32)).reshape(1, C2, 1, 1)
    s2 = jax.random.normal(k2s, (N2, C2), dtype=jnp.float32)
    t2 = (x2 + w2 * n2 + b2) * s2.reshape(N2, C2, 1, 1)
    ref2 = jnp.where(t2 >= 0, t2, 0.2 * t2)
    out4 = jax.block_until_ready(
        styled_post_conv(x2, w2, b2, s2, n2, max_block_bytes=2048))
    assert jnp.allclose(out4, ref2, atol=1e-5), "mismatch (ragged tiles)"

    print("KERNEL_OK")
</pallas_src>

<mosaic_0001>
module attributes {stable_mosaic.version = 11 : i64} {
  func.func @_noise_injection_kernel(%arg0: i32, %arg1: i32, %arg2: i32, %arg3: memref<1x4x256xf32, #tpu.memory_space<vmem>>, %arg4: memref<1x1x256xf32, #tpu.memory_space<vmem>>, %arg5: memref<4x1xf32, #tpu.memory_space<vmem>>, %arg6: memref<1x4x256xf32, #tpu.memory_space<vmem>>) attributes {dimension_semantics = [#tpu.dimension_semantics<parallel>, #tpu.dimension_semantics<parallel>, #tpu.dimension_semantics<arbitrary>], iteration_bounds = array<i64: 2, 1, 1>, scalar_prefetch = 0 : i64, scratch_operands = 0 : i64, tpu.core_type = #tpu.core_type<tc>, window_params = [{transform_indices = @transform_0, window_bounds = array<i64: 1, 4, 256>}, {transform_indices = @transform_1, window_bounds = array<i64: 1, 1, 256>}, {transform_indices = @transform_2, window_bounds = array<i64: 4, 1>}, {transform_indices = @transform_3, window_bounds = array<i64: 1, 4, 256>}]} {
    %c0 = arith.constant 0 : index
    %c0_0 = arith.constant 0 : index
    %c0_1 = arith.constant 0 : index
    %0 = vector.load %arg3[%c0, %c0_0, %c0_1] : memref<1x4x256xf32, #tpu.memory_space<vmem>>, vector<1x4x256xf32>
    %1 = vector.shape_cast %0 : vector<1x4x256xf32> to vector<4x256xf32>
    %c0_2 = arith.constant 0 : index
    %c0_3 = arith.constant 0 : index
    %2 = vector.load %arg5[%c0_2, %c0_3] : memref<4x1xf32, #tpu.memory_space<vmem>>, vector<4x1xf32>
    %c0_4 = arith.constant 0 : index
    %c0_5 = arith.constant 0 : index
    %c0_6 = arith.constant 0 : index
    %3 = vector.load %arg4[%c0_4, %c0_5, %c0_6] : memref<1x1x256xf32, #tpu.memory_space<vmem>>, vector<1x1x256xf32>
    %4 = vector.shape_cast %3 : vector<1x1x256xf32> to vector<1x256xf32>
    %5 = vector.broadcast %2 : vector<4x1xf32> to vector<4x256xf32>
    %6 = vector.broadcast %4 : vector<1x256xf32> to vector<4x256xf32>
    %7 = arith.mulf %5, %6 : vector<4x256xf32>
    %8 = arith.addf %1, %7 : vector<4x256xf32>
    %c0_7 = arith.constant 0 : index
    %c0_8 = arith.constant 0 : index
    %c0_9 = arith.constant 0 : index
    %9 = vector.load %arg6[%c0_7, %c0_8, %c0_9] : memref<1x4x256xf32, #tpu.memory_space<vmem>>, vector<1x4x256xf32>
    %10 = vector.shape_cast %9 : vector<1x4x256xf32> to vector<4x256xf32>
    %11 = vector.shape_cast %8 : vector<4x256xf32> to vector<1x4x256xf32>
    tpu.vector_store %arg6[%c0_7, %c0_8, %c0_9], %11 {strides = array<i32>} : memref<1x4x256xf32, #tpu.memory_space<vmem>>, vector<1x4x256xf32>,
    return
  }
  func.func @transform_0(%arg0: i32, %arg1: i32, %arg2: i32) -> (i32, i32, i32) {
    %c0_i32 = arith.constant 0 : i32
    return %arg0, %arg2, %arg1 : i32, i32, i32
  }
  func.func @transform_1(%arg0: i32, %arg1: i32, %arg2: i32) -> (i32, i32, i32) {
    %c0_i32 = arith.constant 0 : i32
    %c0_i32_0 = arith.constant 0 : i32
    return %arg0, %c0_i32, %arg1 : i32, i32, i32
  }
  func.func @transform_2(%arg0: i32, %arg1: i32, %arg2: i32) -> (i32, i32) {
    %c0_i32 = arith.constant 0 : i32
    %c0_i32_0 = arith.constant 0 : i32
    return %arg2, %c0_i32 : i32, i32
  }
  func.func @transform_3(%arg0: i32, %arg1: i32, %arg2: i32) -> (i32, i32, i32) {
    %c0_i32 = arith.constant 0 : i32
    return %arg0, %arg2, %arg1 : i32, i32, i32
  }
}

</mosaic_0001>

<bundles_post_ra>
// kernel: tpu_custom_call.1
= control target key start
LH: loop header
LB: loop body
LE: loop exit
PB: predicated region body
PF: predicated region fallthrough
CT: control target
= control target key end

     0   :  { %8 = vsyncpa [#allocation3], 0  ;;  %s837_s0 = inlined_call_operand.hbm [shape: f32[2,4,256], index: 0, kind: input, shape index: {}, may-alias: {0,3}]   ;;  %s838_s1 = inlined_call_operand.vmem [shape: f32[2,1,256], index: 1, kind: input, shape index: {}]   ;;  %s839_s2 = inlined_call_operand.vmem [shape: f32[4,1], index: 2, kind: input, shape index: {}]   ;;  %s840_s3 = inlined_call_operand.hbm [shape: f32[2,4,256], index: 3, kind: output, shape index: {}, may-alias: {0,3}]  }
   0x1   :  { %10 = vsyncpa [#allocation3 + $0x1], 0 }
   0x2   :  { %11 = vsyncpa [#allocation4], 0 }
   0x3   :  { %13 = vsyncpa [#allocation4 + $0x1], 0  ;;  %s657_s12 = smov 0   ;;  %s659_s13 = smov 0  }
   0x4   :  { %s661_s14 = smov 0   ;;  %s663_s15 = smov 0  }
   0x5   :  { %s665_s16 = smov 0   ;;  %s667_s17 = smov 0  }
   0x6 LB: > { %s437_s18 = sadd.s32 4294967295, %s632_s17   ;;  %s438_s19 = sadd.s32 4294967294, %s632_s17   ;;  %s632_s17 = sphi %s667_s17, %s19_s17   ;;  %s628_s16 = sphi %s665_s16, %s856_s16   ;;  %s624_s15 = sphi %s663_s15, %s855_s15   ;;  %s620_s14 = sphi %s661_s14, %s854_s14   ;;  %s616_s13 = sphi %s659_s13, %s853_s13   ;;  %s612_s12 = sphi %s657_s12, %s852_s12  }
   0x7   : > { %s38_s20 = sadd.s32 1, %s628_s16  ;;  %s49_s21 = sadd.s32 1, %s620_s14 }
   0x8   : > { %p40_p0 = scmp.ge.s32.totalorder %s38_s20, 2  ;;  %p56_p1 = scmp.ne.s32.totalorder %s620_s14, %s616_s13 }
   0x9   : > { %p57_p2 = scmp.eq.s32.totalorder %s632_s17, 0  ;;  %p62_p3 = scmp.ne.s32.totalorder %s616_s13, %s612_s12 }
   0xa   : > { %s858_s20 = smov (%p40_p0, %s38_s20), 0  ;;  %p63_p5 = scmp.eq.s32.totalorder %s437_s18, 0 }
   0xb   : > { %p698_p4 = por %p57_p2, %p56_p1  ;;  %s42_s23 = ssub.s32 %s628_s16, %s858_s20 }
   0xc   : > { %p144_p6 = scmp.eq.s32.totalorder %s437_s18, 1  ;;  %p47_p7 = scmp.eq.s32.totalorder %s42_s23, 0 }
   0xd   : > { %p704_p8 = por %p63_p5, %p62_p3  ;;  %p150_p10 = scmp.eq.s32.totalorder %s438_s19, 1 }
   0xe   : > { %p708_p9 = por %p144_p6, %p56_p1  ;;  %p468_p13 = scmp.lt.s32.totalorder %s632_s17, 2 }
   0xf   : > { %s713_s26 = scalar_select %p47_p7, %s620_s14, %s49_s21  }
  0x10   : > { %s844_s25 = scalar_select %p708_p9, 1, 0 }
  0x11   : > { %p715_p11 = por %p150_p10, %p62_p3  ;;  %s177_s28 = sand.u32 1, %s620_s14  }
  0x12   : > { %s442_s29 = sshll.u32 %s177_s28, 3  ;;  %s454_s30 = sshll.u32 %s628_s16, 7 }
  0x13   : > { %s845_s27 = scalar_select %p715_p11, 1, 0 }
  0x14   : > { %s726_s6 = scalar_lea.hbm %s837_s0, %s454_s30  ;;  %s181_s7 = scalar_lea.vmem [#allocation2], %s442_s29 }
  0x15   : > { %s193_s8 = sshll.u32 %s181_s7, 4  ;;  %p732_p0 = pnand %p468_p13, %p698_p4  ;;  %s728_s8 = int_to_ptr.vmem [resolvable:$true] %s193_s8 }
  0x16   : > { %s178_s10 = scalar_lea.sflag [#allocation3], %s177_s28  ;;  %s520_s11 = scalar_lea.hbm %s726_s6, 128 }
  0x17   : > { %p521_p3 = scmp.ne.s32.totalorder %s726_s6, %s520_s11  ;;  %p522_p5 = pneg %p732_p0 }
  0x18   : > { %s525_s21 = scalar_lea.hbm %s837_s0, 256  ;;  %p526_p4 = scmp.lt.u32.totalorder %s726_s6, %s837_s0 }
  0x19   : > { %p523_p6 = pnand %p522_p5, %p521_p3  ;;  %p527_p10 = scmp.lt.u32.totalorder %s525_s21, %s520_s11 }
  0x1a   : > { %p529_p12 = scmp.lt.u32.totalorder %s520_s11, %s726_s6 }
  0x1b   : > { %p524_p7 = pneg %p523_p6  ;;  %p528_p13 = por %p527_p10, %p526_p4 }
  0x1d   : > { %p530_p1 = por %p529_p12, %p528_p13 }
  0x1f   : > { %p531_p2 = pnand %p530_p1, %p524_p7 }
  0x21   : > { %534 = shalt.err (!%p531_p2)
}
  0x22   : > { %s535_s28 = scalar_lea.vmem %s728_s8, 128  ;;  %s634_s29 = smov [#allocation2]  }
  0x23   : > { %p536_p3 = scmp.ne.s32.totalorder %s728_s8, %s535_s28  ;;  %s540_s30 = sshll.u32 %s634_s29, 4  ;;  %s541_s30 = int_to_ptr.vmem [resolvable:$false] %s540_s30 }
  0x24   : > { %s542_s4 = scalar_lea.vmem %s541_s30, 256  ;;  %p543_p9 = scmp.lt.s32.totalorder %s728_s8, %s541_s30 }
  0x25   : > { %p538_p6 = pnand %p536_p3, %p522_p5  ;;  %p544_p4 = scmp.lt.s32.totalorder %s542_s4, %s535_s28 }
  0x27   : > { %p539_p11 = pneg %p538_p6  ;;  %p545_p10 = por %p544_p4, %p543_p9 }
  0x29   : > { %p546_p12 = pnand %p545_p10, %p539_p11 }
  0x2b   : > { %549 = shalt.err (!%p546_p12)
}
  0x2c   : > { %463 = dma.hbm_to_vmem [thread:$0]  (!%p732_p0), %s726_s6, 128, %s728_s8, %s178_s10  }
  0x2d   : > { %p847_p1 = scmp.lt.s32.totalorder %s632_s17, 3  ;;  %p848_p2 = scmp.ge.s32.totalorder %s632_s17, 1 }
  0x2f   : > { %p211_p5 = pnand %p848_p2, %p847_p1 }
  0x30   : > { %s768_s5 = sand.u32 (!%p211_p5), 1, %s616_s13  }
  0x31   : > { %214 = sbr.rel (%p211_p5) target bundleno = 207 (0xcf), region = 32  ;;  %s446_s7 = sshll.u32 (!%p211_p5), %s768_s5, 3 }
  0x32   : > { %s217_s11 = scalar_lea.sflag (!%p211_p5), [#allocation3], %s768_s5  ;;  %s220_s18 = scalar_lea.vmem (!%p211_p5), [#allocation2], %s446_s7 }
  0x38   : > { %603 = dma.done.wait (%p704_p8), %s217_s11, 128  }
  0x39   : > { %605 = vsyncadd (%p704_p8), %s217_s11, 4294967168  ;;  %v635_v0 = vmov 0   ;;  %v271_v1 = vld [vmem:[%s839_s2] sm:$0xf]  ;;  %p257_p9 = scmp.lt.s32.totalorder %s624_s15, 1  ;;  %v279_v2 = vlaneseq  ;;  %s455_s22 = sshll.u32 %s624_s15, 7 }
  0x3a   : > { %519 = vset.pattern.permute.xlu0 %v635_v0  ;;  %v270_v12 = vld [vmem:[%s220_s18] sm:$0xff]  ;;  %s254_s23 = scalar_lea.vmem [#allocation5], %s446_s7  ;;  %s788_s4 = scalar_lea.hbm %s840_s3, %s455_s22 }
  0x3b   : > { %275 = vperm.xlu0 %519, %v271_v1   ;;  %s258_s9 = scalar_select %p257_p9, %s624_s15, 1  ;;  %v280_v3 = vshrl.u32 %v279_v2, 7 }
  0x3c   : > { %s316_s28 = sshll.u32 %s254_s23, 4  ;;  %s298_s11 = scalar_lea.sflag [#allocation4], %s768_s5  ;;  %s790_s28 = int_to_ptr.vmem [resolvable:$true] %s316_s28 }
  0x3d   : > { %s448_s10 = sshll.u32 %s258_s9, 1  ;;  %v281_v4 = vsub.s32 0, %v280_v3  ;;  %v285_v5 = vsub.s32 1, %v280_v3  ;;  %s550_s6 = scalar_lea.vmem %s790_s28, 128 }
  0x3e   : > { %s263_s24 = scalar_lea.vmem %s838_s1, %s448_s10  ;;  %p551_p8 = scmp.ne.s32.totalorder %s790_s28, %s550_s6 }
  0x3f   : > { %v272_v6 = vld [vmem:[%s263_s24] sm:$0x3]  ;;  %p849_p11 = scmp.ne.s32.totalorder %s844_s25, 0  ;;  %s636_s15 = smov [#allocation5]  }
  0x40   : > { %v282_v7 = vrot.slane %v272_v6, %v281_v4  ;;  %v286_v8 = vrot.slane %v272_v6, %v285_v5  ;;  %s554_s7 = sshll.u32 %s636_s15, 4  ;;  %s555_s7 = int_to_ptr.vmem [resolvable:$false] %s554_s7 }
  0x41   : > { %p552_p0 = pnand %p551_p8, %p849_p11  ;;  %s556_s18 = scalar_lea.vmem %s555_s7, 256 }
  0x42   : > { %p557_p13 = scmp.lt.s32.totalorder %s790_s28, %s555_s7  ;;  %p558_p3 = scmp.lt.s32.totalorder %s556_s18, %s550_s6 }
  0x43   : > { %p553_p7 = pneg %p552_p0 }
  0x44   : > { %p559_p6 = por %p558_p3, %p557_p13 }
  0x46   : > { %p560_p4 = pnand %p559_p6, %p553_p7 }
  0xba   : > { %v276_v9 = vpop.permute.xlu0 %275 }
  0xbb   : > { %v289_v10 = vmul.f32 %v282_v7, %v276_v9  ;;  %v290_v11 = vmul.f32 %v286_v8, %v276_v9 }
  0xbd   : > { %v293_v13 = vcombine.low %v289_v10, %v290_v11 }
  0xbf   : > { %v295_v14 = vadd.f32 %v293_v13, %v270_v12 }
  0xc1   : > { %296 = vst [vmem:[%s254_s23] sm:$0xff] %v295_v14 }
  0xc2   : > { %563 = shalt.err (!%p560_p4)
}
  0xc3   : > { %s564_s5 = scalar_lea.hbm %s788_s4, 128  ;;  %s568_s10 = scalar_lea.hbm %s840_s3, 256 }
  0xc4   : > { %p565_p10 = scmp.ne.s32.totalorder %s788_s4, %s564_s5  ;;  %p569_p2 = scmp.lt.u32.totalorder %s788_s4, %s840_s3 }
  0xc5   : > { %p570_p5 = scmp.lt.u32.totalorder %s568_s10, %s564_s5  ;;  %p572_p8 = scmp.lt.u32.totalorder %s564_s5, %s788_s4 }
  0xc6   : > { %p566_p12 = pnand %p565_p10, %p849_p11 }
  0xc7   : > { %p571_p9 = por %p570_p5, %p569_p2 }
  0xc8   : > { %p567_p1 = pneg %p566_p12 }
  0xc9   : > { %p573_p0 = por %p572_p8, %p571_p9 }
  0xcb   : > { %p574_p7 = pnand %p573_p0, %p567_p1 }
  0xcd   : > { %577 = shalt.err (!%p574_p7)
}
  0xce   : > { %458 = dma.vmem_to_hbm [thread:$0]  (%p849_p11), %s790_s28, 128, %s788_s4, %s298_s11  }
  0xcf PF: > { %s328_s24 = sand.u32 1, %s612_s12   ;;  %p850_p13 = scmp.ne.s32.totalorder %s845_s27, 0 }
  0xd0   : > { %p851_p3 = scmp.ge.s32.totalorder %s632_s17, 2  ;;  %s329_s22 = scalar_lea.sflag [#allocation4], %s328_s24 }
  0xd2   : > { %p465_p6 = pnand %p851_p3, %p850_p13 }
  0xd4   : > { %607 = dma.done.wait (!%p465_p6), %s329_s22, 128  }
  0xd5   : > { %609 = vsyncadd (!%p465_p6), %s329_s22, 4294967168  ;;  %s19_s17 = sadd.s32 1, %s632_s17   ;;  %s852_s12 = smov %s616_s13 }
  0xd6   : > { %p16_p4 = scmp.ge.s32.totalorder %s19_s17, 4   ;;  %s853_s13 = smov %s620_s14 }
  0xd7   : > { %s854_s14 = smov %s713_s26  ;;  %s855_s15 = smov %s628_s16 }
  0xd8   : > { %s856_s16 = smov %s858_s20  ;;  %18 = sbr.rel (!%p16_p4) target bundleno = 6 (0x6), region = 83 }
  0xdf   :  { %334 = vsyncpa [#allocation3], 1 }
  0xe0   :  { %336 = vsyncpa [#allocation3 + $0x1], 1 }
  0xe1   :  { %337 = vsyncpa [#allocation4], 1 }
  0xe2   :  { %339 = vsyncpa [#allocation4 + $0x1], 1 }

</bundles_post_ra>
